<compile_context>
chip_gen: v7x
topology: tpu7x:2x2x1
jax: 0.10.0
libtpu: 0.0.40
codegen_flags: <defaults>
</compile_context>

<pallas_src>
import jax
import jax.numpy as jnp
from jax.experimental import pallas as pl
from jax.experimental.pallas import tpu as pltpu

EPS = 1e-5


def _elu(x):
    # F.elu with alpha=1:  x if x > 0 else exp(x) - 1
    return jnp.where(x > 0, x, jnp.exp(jnp.minimum(x, 0.0)) - 1.0)


def _bn_train(x, gamma, beta):
    # BatchNorm1d training mode: batch mean, biased batch variance, eps=1e-5.
    # Single-pass statistics (sum / sum-of-squares) to halve sublane reductions.
    inv_n = 1.0 / x.shape[0]
    s = jnp.sum(x, axis=0, keepdims=True)
    ss = jnp.sum(x * x, axis=0, keepdims=True)
    mean = s * inv_n
    var = jnp.maximum(ss * inv_n - mean * mean, 0.0)
    return (x - mean) * jax.lax.rsqrt(var + EPS) * gamma + beta


def brcf_kernel(x_ref, w_br_ref, w1_ref, w2_ref, w3_ref, vec_ref, out_ref):
    # Static dims derived from ref shapes.
    br_out = w_br_ref.shape[1]
    h1 = w1_ref.shape[1]          # 512
    h2 = w2_ref.shape[1]          # 256
    num_policy = w3_ref.shape[1]

    # Packed-vector slab rows:
    #   0: b_br   1: gamma_br   2: beta_br
    #   3: gamma1 4: beta1      5: gamma2   6: beta2   7: b3
    x = x_ref[...]

    # --- BalancingRepresentationLayer: Linear -> ELU -> BatchNorm ---
    h = jnp.dot(x, w_br_ref[...], preferred_element_type=jnp.float32)
    h = h + vec_ref[0:1, 0:br_out]
    br_h = _bn_train(_elu(h), vec_ref[1:2, 0:br_out], vec_ref[2:3, 0:br_out])

    # --- GRL (gradient reversal = identity in forward) ---
    # grl_l1/grl_l2 biases omitted: cancelled by training-mode BN mean subtraction.
    e = jnp.dot(br_h, w1_ref[...], preferred_element_type=jnp.float32)
    e = _elu(_bn_train(e, vec_ref[3:4, 0:h1], vec_ref[4:5, 0:h1]))
    e = jnp.dot(e, w2_ref[...], preferred_element_type=jnp.float32)
    e = _elu(_bn_train(e, vec_ref[5:6, 0:h2], vec_ref[6:7, 0:h2]))
    z = jnp.dot(e, w3_ref[...], preferred_element_type=jnp.float32)
    z = z + vec_ref[7:8, 0:num_policy]
    sig = pl.reciprocal(1.0 + jnp.exp(-z), approx=False)   # exact; EUP-friendly

    # --- single lane-dense output slab: [ br_h | sigmoid | zero pad ] ---
    out_ref[...] = jnp.zeros_like(out_ref)
    out_ref[:, 0:br_out] = br_h
    out_ref[:, br_out:br_out + num_policy] = sig


def brcf_forward(x, params):
    """Runs the whole forward pass inside one grid-less Pallas kernel."""
    x = x.astype(jnp.float32)
    B = x.shape[0]
    w_br, w1, w2, w3 = params["w_br"], params["w1"], params["w2"], params["w3"]
    br_out = w_br.shape[1]
    h1, h2 = w1.shape[1], w2.shape[1]
    num_policy = w3.shape[1]

    # Pack all small vectors into one [8, slab_w] slab (fewer DMA descriptors).
    slab_w = max(br_out, h1, h2, num_policy)
    slab_w = ((slab_w + 127) // 128) * 128

    def row(v):
        v = v.reshape(-1).astype(jnp.float32)
        return jnp.pad(v, (0, slab_w - v.shape[0]))

    vecs = jnp.stack(
        [row(params["b_br"]), row(params["g_br"]), row(params["be_br"]),
         row(params["g1"]), row(params["be1"]),
         row(params["g2"]), row(params["be2"]),
         row(params["b3"])],
        axis=0)

    out_w = max(128, ((br_out + num_policy + 127) // 128) * 128)

    vmem = pl.BlockSpec(memory_space=pltpu.MemorySpace.VMEM)
    packed = pl.pallas_call(
        brcf_kernel,
        out_shape=jax.ShapeDtypeStruct((B, out_w), jnp.float32),
        in_specs=[vmem] * 6,
        out_specs=vmem,
    )(x, w_br, w1, w2, w3, vecs)

    br_h = packed[:, :br_out]
    e = packed[:, br_out:br_out + num_policy]
    return br_h, e


def init_params(key, br_input_dim, br_output_dim, num_policy):
    """Deterministic synthetic params (linear weights stored [in, out])."""
    shapes = {
        "w_br": (br_input_dim, br_output_dim), "b_br": (br_output_dim,),
        "g_br": (br_output_dim,), "be_br": (br_output_dim,),
        "w1": (br_output_dim, 512), "b1": (512,), "g1": (512,), "be1": (512,),
        "w2": (512, 256), "b2": (256,), "g2": (256,), "be2": (256,),
        "w3": (256, num_policy), "b3": (num_policy,),
    }
    params = {}
    keys = jax.random.split(key, len(shapes))
    for k, (name, shp) in zip(keys, sorted(shapes.items())):
        if name.startswith("g"):            # batchnorm gamma ~ 1
            params[name] = jnp.ones(shp, jnp.float32) + 0.05 * jax.random.normal(k, shp)
        elif name.startswith("b"):          # biases / betas
            params[name] = 0.05 * jax.random.normal(k, shp, jnp.float32)
        else:                               # linear weights
            params[name] = jax.random.normal(k, shp, jnp.float32) / jnp.sqrt(shp[0])
    return params


def reference_forward(x, params):
    """Pure-JAX faithful reference (keeps all biases, two-pass BN stats)."""
    x = x.astype(jnp.float32)

    def bn(h, gamma, beta):
        mean = jnp.mean(h, axis=0, keepdims=True)
        var = jnp.mean((h - mean) ** 2, axis=0, keepdims=True)
        return (h - mean) / jnp.sqrt(var + EPS) * gamma + beta

    def elu(h):
        return jnp.where(h > 0, h, jnp.exp(jnp.minimum(h, 0.0)) - 1.0)

    br_h = bn(elu(x @ params["w_br"] + params["b_br"]), params["g_br"], params["be_br"])
    e = elu(bn(br_h @ params["w1"] + params["b1"], params["g1"], params["be1"]))
    e = elu(bn(e @ params["w2"] + params["b2"], params["g2"], params["be2"]))
    z = e @ params["w3"] + params["b3"]
    return br_h, 1.0 / (1.0 + jnp.exp(-z))


if __name__ == "__main__":
    br_input_dim, br_output_dim, num_policy = 32, 64, 4
    batch = 8

    key = jax.random.PRNGKey(0)
    kx, kp = jax.random.split(key)
    x = jax.random.normal(kx, (batch, br_input_dim), jnp.float32)
    params = init_params(kp, br_input_dim, br_output_dim, num_policy)

    br_h, e = jax.block_until_ready(brcf_forward(x, params))

    br_h_ref, e_ref = reference_forward(x, params)
    assert br_h.shape == br_h_ref.shape and br_h.dtype == br_h_ref.dtype
    assert e.shape == e_ref.shape and e.dtype == e_ref.dtype
    assert jnp.allclose(br_h, br_h_ref, atol=1e-4, rtol=1e-4), "br_h mismatch vs reference"
    assert jnp.allclose(e, e_ref, atol=1e-4, rtol=1e-4), "e mismatch vs reference"

    print("KERNEL_OK")
</pallas_src>

<mosaic_0001>
module attributes {stable_mosaic.version = 11 : i64} {
  func.func @brcf_kernel(%arg0: memref<8x32xf32, #tpu.memory_space<vmem>>, %arg1: memref<32x64xf32, #tpu.memory_space<vmem>>, %arg2: memref<64x512xf32, #tpu.memory_space<vmem>>, %arg3: memref<512x256xf32, #tpu.memory_space<vmem>>, %arg4: memref<256x4xf32, #tpu.memory_space<vmem>>, %arg5: memref<8x512xf32, #tpu.memory_space<vmem>>, %arg6: memref<8x128xf32, #tpu.memory_space<vmem>>) attributes {dimension_semantics = [], scalar_prefetch = 0 : i64, scratch_operands = 0 : i64, tpu.core_type = #tpu.core_type<tc>} {
    %c0 = arith.constant 0 : index
    %c0_0 = arith.constant 0 : index
    %0 = vector.load %arg0[%c0, %c0_0] : memref<8x32xf32, #tpu.memory_space<vmem>>, vector<8x32xf32>
    %c0_1 = arith.constant 0 : index
    %c0_2 = arith.constant 0 : index
    %1 = vector.load %arg1[%c0_1, %c0_2] : memref<32x64xf32, #tpu.memory_space<vmem>>, vector<32x64xf32>
    %cst = arith.constant dense<0.000000e+00> : vector<8x64xf32>
    %2 = tpu.matmul %0, %1, %cst {dimension_numbers = #tpu.dot_dimension_numbers<[1], [0], [0], [1], [0, 0, 1, 1], [], []>} : vector<8x32xf32>, vector<32x64xf32>, vector<8x64xf32> -> vector<8x64xf32>
    %c0_3 = arith.constant 0 : index
    %c0_4 = arith.constant 0 : index
    %3 = vector.load %arg5[%c0_3, %c0_4] : memref<8x512xf32, #tpu.memory_space<vmem>>, vector<1x64xf32>
    %4 = vector.broadcast %3 : vector<1x64xf32> to vector<8x64xf32>
    %5 = arith.addf %2, %4 : vector<8x64xf32>
    %cst_5 = arith.constant 0.000000e+00 : f32
    %6 = vector.broadcast %cst_5 : f32 to vector<8x64xf32>
    %7 = arith.cmpf ogt, %5, %6 : vector<8x64xf32>
    %cst_6 = arith.constant 0.000000e+00 : f32
    %8 = vector.broadcast %cst_6 : f32 to vector<8x64xf32>
    %9 = arith.minimumf %5, %8 : vector<8x64xf32>
    %10 = math.exp %9 : vector<8x64xf32>
    %cst_7 = arith.constant 1.000000e+00 : f32
    %11 = vector.broadcast %cst_7 : f32 to vector<8x64xf32>
    %12 = arith.subf %10, %11 : vector<8x64xf32>
    %13 = arith.select %7, %5, %12 : vector<8x64xi1>, vector<8x64xf32>
    %c1 = arith.constant 1 : index
    %c0_8 = arith.constant 0 : index
    %14 = vector.load %arg5[%c1, %c0_8] : memref<8x512xf32, #tpu.memory_space<vmem>>, vector<1x64xf32>
    %c2 = arith.constant 2 : index
    %c0_9 = arith.constant 0 : index
    %15 = vector.load %arg5[%c2, %c0_9] : memref<8x512xf32, #tpu.memory_space<vmem>>, vector<1x64xf32>
    %cst_10 = arith.constant dense<0.000000e+00> : vector<64xf32>
    %16 = vector.multi_reduction <add>, %13, %cst_10 [0] : vector<8x64xf32> to vector<64xf32>
    %17 = vector.shape_cast %16 : vector<64xf32> to vector<1x64xf32>
    %18 = arith.mulf %13, %13 : vector<8x64xf32>
    %cst_11 = arith.constant dense<0.000000e+00> : vector<64xf32>
    %19 = vector.multi_reduction <add>, %18, %cst_11 [0] : vector<8x64xf32> to vector<64xf32>
    %20 = vector.shape_cast %19 : vector<64xf32> to vector<1x64xf32>
    %cst_12 = arith.constant 1.250000e-01 : f32
    %21 = vector.broadcast %cst_12 : f32 to vector<1x64xf32>
    %22 = arith.mulf %17, %21 : vector<1x64xf32>
    %cst_13 = arith.constant 1.250000e-01 : f32
    %23 = vector.broadcast %cst_13 : f32 to vector<1x64xf32>
    %24 = arith.mulf %20, %23 : vector<1x64xf32>
    %25 = arith.mulf %22, %22 : vector<1x64xf32>
    %26 = arith.subf %24, %25 : vector<1x64xf32>
    %cst_14 = arith.constant 0.000000e+00 : f32
    %27 = vector.broadcast %cst_14 : f32 to vector<1x64xf32>
    %28 = arith.maximumf %26, %27 : vector<1x64xf32>
    %29 = vector.broadcast %22 : vector<1x64xf32> to vector<8x64xf32>
    %30 = arith.subf %13, %29 : vector<8x64xf32>
    %cst_15 = arith.constant 9.99999974E-6 : f32
    %31 = vector.broadcast %cst_15 : f32 to vector<1x64xf32>
    %32 = arith.addf %28, %31 : vector<1x64xf32>
    %33 = math.rsqrt %32 : vector<1x64xf32>
    %34 = vector.broadcast %33 : vector<1x64xf32> to vector<8x64xf32>
    %35 = arith.mulf %30, %34 : vector<8x64xf32>
    %36 = vector.broadcast %14 : vector<1x64xf32> to vector<8x64xf32>
    %37 = arith.mulf %35, %36 : vector<8x64xf32>
    %38 = vector.broadcast %15 : vector<1x64xf32> to vector<8x64xf32>
    %39 = arith.addf %37, %38 : vector<8x64xf32>
    %c0_16 = arith.constant 0 : index
    %c0_17 = arith.constant 0 : index
    %40 = vector.load %arg2[%c0_16, %c0_17] : memref<64x512xf32, #tpu.memory_space<vmem>>, vector<64x512xf32>
    %cst_18 = arith.constant dense<0.000000e+00> : vector<8x512xf32>
    %41 = tpu.matmul %39, %40, %cst_18 {dimension_numbers = #tpu.dot_dimension_numbers<[1], [0], [0], [1], [0, 0, 1, 1], [], []>} : vector<8x64xf32>, vector<64x512xf32>, vector<8x512xf32> -> vector<8x512xf32>
    %c3 = arith.constant 3 : index
    %c0_19 = arith.constant 0 : index
    %42 = vector.load %arg5[%c3, %c0_19] : memref<8x512xf32, #tpu.memory_space<vmem>>, vector<1x512xf32>
    %c4 = arith.constant 4 : index
    %c0_20 = arith.constant 0 : index
    %43 = vector.load %arg5[%c4, %c0_20] : memref<8x512xf32, #tpu.memory_space<vmem>>, vector<1x512xf32>
    %cst_21 = arith.constant dense<0.000000e+00> : vector<512xf32>
    %44 = vector.multi_reduction <add>, %41, %cst_21 [0] : vector<8x512xf32> to vector<512xf32>
    %45 = vector.shape_cast %44 : vector<512xf32> to vector<1x512xf32>
    %46 = arith.mulf %41, %41 : vector<8x512xf32>
    %cst_22 = arith.constant dense<0.000000e+00> : vector<512xf32>
    %47 = vector.multi_reduction <add>, %46, %cst_22 [0] : vector<8x512xf32> to vector<512xf32>
    %48 = vector.shape_cast %47 : vector<512xf32> to vector<1x512xf32>
    %cst_23 = arith.constant 1.250000e-01 : f32
    %49 = vector.broadcast %cst_23 : f32 to vector<1x512xf32>
    %50 = arith.mulf %45, %49 : vector<1x512xf32>
    %cst_24 = arith.constant 1.250000e-01 : f32
    %51 = vector.broadcast %cst_24 : f32 to vector<1x512xf32>
    %52 = arith.mulf %48, %51 : vector<1x512xf32>
    %53 = arith.mulf %50, %50 : vector<1x512xf32>
    %54 = arith.subf %52, %53 : vector<1x512xf32>
    %cst_25 = arith.constant 0.000000e+00 : f32
    %55 = vector.broadcast %cst_25 : f32 to vector<1x512xf32>
    %56 = arith.maximumf %54, %55 : vector<1x512xf32>
    %57 = vector.broadcast %50 : vector<1x512xf32> to vector<8x512xf32>
    %58 = arith.subf %41, %57 : vector<8x512xf32>
    %cst_26 = arith.constant 9.99999974E-6 : f32
    %59 = vector.broadcast %cst_26 : f32 to vector<1x512xf32>
    %60 = arith.addf %56, %59 : vector<1x512xf32>
    %61 = math.rsqrt %60 : vector<1x512xf32>
    %62 = vector.broadcast %61 : vector<1x512xf32> to vector<8x512xf32>
    %63 = arith.mulf %58, %62 : vector<8x512xf32>
    %64 = vector.broadcast %42 : vector<1x512xf32> to vector<8x512xf32>
    %65 = arith.mulf %63, %64 : vector<8x512xf32>
    %66 = vector.broadcast %43 : vector<1x512xf32> to vector<8x512xf32>
    %67 = arith.addf %65, %66 : vector<8x512xf32>
    %cst_27 = arith.constant 0.000000e+00 : f32
    %68 = vector.broadcast %cst_27 : f32 to vector<8x512xf32>
    %69 = arith.cmpf ogt, %67, %68 : vector<8x512xf32>
    %cst_28 = arith.constant 0.000000e+00 : f32
    %70 = vector.broadcast %cst_28 : f32 to vector<8x512xf32>
    %71 = arith.minimumf %67, %70 : vector<8x512xf32>
    %72 = math.exp %71 : vector<8x512xf32>
    %cst_29 = arith.constant 1.000000e+00 : f32
    %73 = vector.broadcast %cst_29 : f32 to vector<8x512xf32>
    %74 = arith.subf %72, %73 : vector<8x512xf32>
    %75 = arith.select %69, %67, %74 : vector<8x512xi1>, vector<8x512xf32>
    %c0_30 = arith.constant 0 : index
    %c0_31 = arith.constant 0 : index
    %76 = vector.load %arg3[%c0_30, %c0_31] : memref<512x256xf32, #tpu.memory_space<vmem>>, vector<512x256xf32>
    %cst_32 = arith.constant dense<0.000000e+00> : vector<8x256xf32>
    %77 = tpu.matmul %75, %76, %cst_32 {dimension_numbers = #tpu.dot_dimension_numbers<[1], [0], [0], [1], [0, 0, 1, 1], [], []>} : vector<8x512xf32>, vector<512x256xf32>, vector<8x256xf32> -> vector<8x256xf32>
    %c5 = arith.constant 5 : index
    %c0_33 = arith.constant 0 : index
    %78 = vector.load %arg5[%c5, %c0_33] : memref<8x512xf32, #tpu.memory_space<vmem>>, vector<1x256xf32>
    %c6 = arith.constant 6 : index
    %c0_34 = arith.constant 0 : index
    %79 = vector.load %arg5[%c6, %c0_34] : memref<8x512xf32, #tpu.memory_space<vmem>>, vector<1x256xf32>
    %cst_35 = arith.constant dense<0.000000e+00> : vector<256xf32>
    %80 = vector.multi_reduction <add>, %77, %cst_35 [0] : vector<8x256xf32> to vector<256xf32>
    %81 = vector.shape_cast %80 : vector<256xf32> to vector<1x256xf32>
    %82 = arith.mulf %77, %77 : vector<8x256xf32>
    %cst_36 = arith.constant dense<0.000000e+00> : vector<256xf32>
    %83 = vector.multi_reduction <add>, %82, %cst_36 [0] : vector<8x256xf32> to vector<256xf32>
    %84 = vector.shape_cast %83 : vector<256xf32> to vector<1x256xf32>
    %cst_37 = arith.constant 1.250000e-01 : f32
    %85 = vector.broadcast %cst_37 : f32 to vector<1x256xf32>
    %86 = arith.mulf %81, %85 : vector<1x256xf32>
    %cst_38 = arith.constant 1.250000e-01 : f32
    %87 = vector.broadcast %cst_38 : f32 to vector<1x256xf32>
    %88 = arith.mulf %84, %87 : vector<1x256xf32>
    %89 = arith.mulf %86, %86 : vector<1x256xf32>
    %90 = arith.subf %88, %89 : vector<1x256xf32>
    %cst_39 = arith.constant 0.000000e+00 : f32
    %91 = vector.broadcast %cst_39 : f32 to vector<1x256xf32>
    %92 = arith.maximumf %90, %91 : vector<1x256xf32>
    %93 = vector.broadcast %86 : vector<1x256xf32> to vector<8x256xf32>
    %94 = arith.subf %77, %93 : vector<8x256xf32>
    %cst_40 = arith.constant 9.99999974E-6 : f32
    %95 = vector.broadcast %cst_40 : f32 to vector<1x256xf32>
    %96 = arith.addf %92, %95 : vector<1x256xf32>
    %97 = math.rsqrt %96 : vector<1x256xf32>
    %98 = vector.broadcast %97 : vector<1x256xf32> to vector<8x256xf32>
    %99 = arith.mulf %94, %98 : vector<8x256xf32>
    %100 = vector.broadcast %78 : vector<1x256xf32> to vector<8x256xf32>
    %101 = arith.mulf %99, %100 : vector<8x256xf32>
    %102 = vector.broadcast %79 : vector<1x256xf32> to vector<8x256xf32>
    %103 = arith.addf %101, %102 : vector<8x256xf32>
    %cst_41 = arith.constant 0.000000e+00 : f32
    %104 = vector.broadcast %cst_41 : f32 to vector<8x256xf32>
    %105 = arith.cmpf ogt, %103, %104 : vector<8x256xf32>
    %cst_42 = arith.constant 0.000000e+00 : f32
    %106 = vector.broadcast %cst_42 : f32 to vector<8x256xf32>
    %107 = arith.minimumf %103, %106 : vector<8x256xf32>
    %108 = math.exp %107 : vector<8x256xf32>
    %cst_43 = arith.constant 1.000000e+00 : f32
    %109 = vector.broadcast %cst_43 : f32 to vector<8x256xf32>
    %110 = arith.subf %108, %109 : vector<8x256xf32>
    %111 = arith.select %105, %103, %110 : vector<8x256xi1>, vector<8x256xf32>
    %c0_44 = arith.constant 0 : index
    %c0_45 = arith.constant 0 : index
    %112 = vector.load %arg4[%c0_44, %c0_45] : memref<256x4xf32, #tpu.memory_space<vmem>>, vector<256x4xf32>
    %cst_46 = arith.constant dense<0.000000e+00> : vector<8x4xf32>
    %113 = tpu.matmul %111, %112, %cst_46 {dimension_numbers = #tpu.dot_dimension_numbers<[1], [0], [0], [1], [0, 0, 1, 1], [], []>} : vector<8x256xf32>, vector<256x4xf32>, vector<8x4xf32> -> vector<8x4xf32>
    %c7 = arith.constant 7 : index
    %c0_47 = arith.constant 0 : index
    %114 = vector.load %arg5[%c7, %c0_47] : memref<8x512xf32, #tpu.memory_space<vmem>>, vector<1x4xf32>
    %115 = vector.broadcast %114 : vector<1x4xf32> to vector<8x4xf32>
    %116 = arith.addf %113, %115 : vector<8x4xf32>
    %cst_48 = arith.constant 0.000000e+00 : f32
    %117 = vector.broadcast %cst_48 : f32 to vector<8x4xf32>
    %118 = arith.subf %117, %116 : vector<8x4xf32>
    %119 = math.exp %118 : vector<8x4xf32>
    %cst_49 = arith.constant 1.000000e+00 : f32
    %120 = vector.broadcast %cst_49 : f32 to vector<8x4xf32>
    %121 = arith.addf %120, %119 : vector<8x4xf32>
    %122 = tpu.reciprocal %121 : vector<8x4xf32> -> vector<8x4xf32>
    %cst_50 = arith.constant 0.000000e+00 : f32
    %123 = vector.broadcast %cst_50 : f32 to vector<8x128xf32>
    %c0_51 = arith.constant 0 : index
    %c0_52 = arith.constant 0 : index
    %124 = vector.load %arg6[%c0_51, %c0_52] : memref<8x128xf32, #tpu.memory_space<vmem>>, vector<8x128xf32>
    tpu.vector_store %arg6[%c0_51, %c0_52], %123 {strides = array<i32>} : memref<8x128xf32, #tpu.memory_space<vmem>>, vector<8x128xf32>,
    %c0_53 = arith.constant 0 : index
    %c0_54 = arith.constant 0 : index
    %125 = vector.load %arg6[%c0_53, %c0_54] : memref<8x128xf32, #tpu.memory_space<vmem>>, vector<8x64xf32>
    tpu.vector_store %arg6[%c0_53, %c0_54], %39 {strides = array<i32>} : memref<8x128xf32, #tpu.memory_space<vmem>>, vector<8x64xf32>,
    %c0_55 = arith.constant 0 : index
    %c64 = arith.constant 64 : index
    %126 = vector.load %arg6[%c0_55, %c64] : memref<8x128xf32, #tpu.memory_space<vmem>>, vector<8x4xf32>
    tpu.vector_store %arg6[%c0_55, %c64], %122 {strides = array<i32>} : memref<8x128xf32, #tpu.memory_space<vmem>>, vector<8x4xf32>,
    return
  }
}

</mosaic_0001>

<bundles_post_ra>
// kernel: tpu_custom_call.1
= control target key start
LH: loop header
LB: loop body
LE: loop exit
PB: predicated region body
PF: predicated region fallthrough
CT: control target
= control target key end

     0   :  { %11 = vsyncpa [#allocation3], 0  ;;  %s1763_s0 = inlined_call_operand.vmem [shape: f32[8,32], index: 0, kind: input, shape index: {}]   ;;  %s1764_s1 = inlined_call_operand.hbm [shape: f32[32,64], index: 1, kind: input, shape index: {}]   ;;  %s1765_s2 = inlined_call_operand.vmem [shape: f32[64,512], index: 2, kind: input, shape index: {}]   ;;  %s1766_s3 = inlined_call_operand.hbm [shape: f32[512,256], index: 3, kind: input, shape index: {}]   ;;  %s1767_s4 = inlined_call_operand.vmem [shape: f32[256,4], index: 4, kind: input, shape index: {}]   ;;  %s1768_s5 = inlined_call_operand.hbm [shape: f32[8,512], index: 5, kind: input, shape index: {}]   ;;  %s1769_s6 = inlined_call_operand.hbm [shape: f32[8,128], index: 6, kind: output, shape index: {}]  }
   0x1   :  { %12 = vsyncpa [#allocation6], 0 }
   0x2   :  { %13 = vsyncpa [#allocation4], 0  ;;  %s1408_s21 = smov [#allocation5]   ;;  %s1314_s25 = scalar_lea.hbm %s1766_s3, 16384 }
   0x3   :  { %s35_s22 = sshll.u32 %s1408_s21, 4  ;;  %p1315_p0 = scmp.ne.s32.totalorder %s1766_s3, %s1314_s25  ;;  %s36_s22 = int_to_ptr.vmem [resolvable:$true] %s35_s22 }
   0x4   :  { %p1318_p1 = scmp.lt.u32.totalorder %s1314_s25, %s1766_s3 }
   0x6   :  { %p1320_p2 = pnand %p1318_p1, %p1315_p0 }
   0x8   :  { %1323 = shalt.err (!%p1320_p2)
}
   0x9   :  { %s1324_s30 = scalar_lea.vmem %s36_s22, 16384  ;;  %p1329_p4 = scmp.lt.s32.totalorder %s36_s22, %s36_s22 }
   0xa   :  { %p1325_p3 = scmp.ne.s32.totalorder %s36_s22, %s1324_s30  ;;  %p1330_p5 = scmp.lt.s32.totalorder %s1324_s30, %s1324_s30 }
   0xc   :  { %p1331_p6 = por %p1330_p5, %p1329_p4 }
   0xe   :  { %p1332_p7 = pnand %p1331_p6, %p1325_p3 }
  0x10   :  { %1335 = shalt.err (!%p1332_p7)
}
  0x11   :  { %s1409_s7 = smov 256   ;;  %s1410_s8 = smov 16  }
  0x12   :  { %41 = dma.hbm_to_vmem [thread:$0]  %s1766_s3, 16384, %s36_s22, [#allocation6], %s1409_s7, %s1409_s7, %s1410_s8  }
  0x13   :  { %s1411_s11 = smov [#allocation2]   ;;  %s1336_s15 = scalar_lea.hbm %s1764_s1, 512 }
  0x14   :  { %s21_s12 = sshll.u32 %s1411_s11, 4  ;;  %p1337_p8 = scmp.ne.s32.totalorder %s1764_s1, %s1336_s15  ;;  %s22_s12 = int_to_ptr.vmem [resolvable:$true] %s21_s12 }
  0x15   :  { %p1340_p9 = scmp.lt.u32.totalorder %s1336_s15, %s1764_s1 }
  0x17   :  { %p1342_p10 = pnand %p1340_p9, %p1337_p8 }
  0x19   :  { %1345 = shalt.err (!%p1342_p10)
}
  0x1a   :  { %s1346_s20 = scalar_lea.vmem %s22_s12, 512  ;;  %p1351_p12 = scmp.lt.s32.totalorder %s22_s12, %s22_s12 }
  0x1b   :  { %p1347_p11 = scmp.ne.s32.totalorder %s22_s12, %s1346_s20  ;;  %p1352_p13 = scmp.lt.s32.totalorder %s1346_s20, %s1346_s20 }
  0x1d   :  { %p1353_p0 = por %p1352_p13, %p1351_p12 }
  0x1f   :  { %p1354_p1 = pnand %p1353_p0, %p1347_p11 }
  0x21   :  { %1357 = shalt.err (!%p1354_p1)
}
  0x22   :  { %s1412_s3 = smov 128   ;;  %s1413_s21 = smov 8  }
  0x23   :  { %27 = dma.hbm_to_vmem [thread:$0]  %s1764_s1, 512, %s22_s12, [#allocation3], %s1412_s3, %s1412_s3, %s1413_s21  }
  0x24   :  { %s1414_s24 = smov [#allocation7]   ;;  %s1358_s28 = scalar_lea.hbm %s1768_s5, 512 }
  0x25   :  { %s50_s25 = sshll.u32 %s1414_s24, 4  ;;  %p1359_p2 = scmp.ne.s32.totalorder %s1768_s5, %s1358_s28  ;;  %s51_s25 = int_to_ptr.vmem [resolvable:$true] %s50_s25 }
  0x26   :  { %p1362_p3 = scmp.lt.u32.totalorder %s1358_s28, %s1768_s5 }
  0x28   :  { %p1364_p4 = pnand %p1362_p3, %p1359_p2 }
  0x2a   :  { %1367 = shalt.err (!%p1364_p4)
}
  0x2b   :  { %s1368_s9 = scalar_lea.vmem %s51_s25, 512  ;;  %p1373_p6 = scmp.lt.s32.totalorder %s51_s25, %s51_s25 }
  0x2c   :  { %p1369_p5 = scmp.ne.s32.totalorder %s51_s25, %s1368_s9  ;;  %p1374_p7 = scmp.lt.s32.totalorder %s1368_s9, %s1368_s9 }
  0x2e   :  { %p1375_p8 = por %p1374_p7, %p1373_p6 }
  0x30   :  { %p1376_p9 = pnand %p1375_p8, %p1369_p5 }
  0x32   :  { %1379 = shalt.err (!%p1376_p9)
}
  0x33   :  { %53 = dma.hbm_to_vmem [thread:$0]  %s1768_s5, 512, %s51_s25, [#allocation6]  }
  0x34   :  { %1402 = dma.done.wait [#allocation3], 512  }
  0x35   :  { %1403 = vsyncadd [#allocation3], 4294966784 }
  0x36   :  { %1404 = dma.done.wait [#allocation6], 16896  }
  0x37   :  { %1405 = vsyncadd [#allocation6], 4294950400  ;;  %v1415_v0 = vmov 0.0|0.0   ;;  %vm1416_vm0 = vmmov 0   ;;  %v1417_v1 = vmov 0.0   ;;  %v64_v2 = vld [vmem:[#allocation2] sm:$0xff] }
  0x38   :  { %1070 = vmatprep.subr.bf16.mxu0 %v1415_v0  ;;  %1067 = vmatprep.mubr.msk.f32.mxu0 %vm1416_vm0, %v1417_v1  ;;  %985 = vst [vmem:[#allocation8] sm:$0xff] %v1417_v1  ;;  %v65_v3 = vld [vmem:[#allocation2 + $0x8] sm:$0xff]  ;;  %v66_v4 = vld [vmem:[#allocation2 + $0x10] sm:$0xff]  ;;  %v67_v6 = vld [vmem:[#allocation2 + $0x18] sm:$0xff]  ;;  %vm69_vm1 = vcmask 261120   ;;  %vm151_vm2 = vcmask 523264  }
  0x39   :  { %277 = vmatprep.mubr.f32.mxu1 %v1417_v1  ;;  %v1071_v5 = vpack.c.bf16 %v65_v3, %v64_v2  ;;  %v1074_v7 = vpack.c.bf16 %v67_v6, %v66_v4  ;;  %v63_v8 = vld [vmem:[%s1763_s0] sm:$0xff]  ;;  %v179_v9 = vld [vmem:[%s1765_s2 + $0x8] sm:$0xff]  ;;  %v181_v32 = vld [vmem:[%s1765_s2 + $0x18] sm:$0xff]  ;;  %s1419_s23 = smov [#allocation8]   ;;  %vm991_vm10 = vcmask 556544  }
  0x3a   :  { %v183_v10 = vld [vmem:[%s1765_s2 + $0x28] sm:$0xff]  ;;  %v178_v11 = vld [vmem:[%s1765_s2] sm:$0xff]  ;;  %v185_v33 = vld [vmem:[%s1765_s2 + $0x38] sm:$0xff]  ;;  %s999_s24 = sshll.u32 %s1419_s23, 4  ;;  %s1000_s24 = int_to_ptr.vmem [resolvable:$true] %s999_s24 }
  0x3b   :  { %1072 = vmatpush3.bf16.msra.mxu0 %v1071_v5  ;;  %v1076_v12 = vpack.c.bf16 %v183_v10, %v179_v9  ;;  %v182_v13 = vld [vmem:[%s1765_s2 + $0x20] sm:$0xff]  ;;  %v187_v14 = vld [vmem:[%s1765_s2 + $0x48] sm:$0xff]  ;;  %v1092_v35 = vpack.c.bf16 %v185_v33, %v181_v32  ;;  %v524_v37 = vld [vmem:[#allocation5 + $0x18] sm:$0xff]  ;;  %s1380_s25 = scalar_lea.vmem %s1000_s24, 128  ;;  %p1385_p11 = scmp.lt.s32.totalorder %s1000_s24, %s1000_s24 }
  0x3c   :  { %1073 = vmatprep.subr.bf16.mxu0 %v1415_v0  ;;  %v191_v15 = vld [vmem:[%s1765_s2 + $0x68] sm:$0xff]  ;;  %v1078_v16 = vpack.c.bf16 %v182_v13, %v178_v11  ;;  %v186_v18 = vld [vmem:[%s1765_s2 + $0x40] sm:$0xff]  ;;  %v523_v40 = vld [vmem:[#allocation5 + $0x10] sm:$0xff]  ;;  %p1381_p10 = scmp.ne.s32.totalorder %s1000_s24, %s1380_s25  ;;  %p1386_p12 = scmp.lt.s32.totalorder %s1380_s25, %s1380_s25 }
  0x3d   :  { %v1080_v17 = vpack.c.bf16 %v191_v15, %v187_v14  ;;  %v190_v19 = vld [vmem:[%s1765_s2 + $0x60] sm:$0xff]  ;;  %v195_v20 = vld [vmem:[%s1765_s2 + $0x88] sm:$0xff]  ;;  %1077 = vmatprep.subr.bf16.mxu1 %v1076_v12  ;;  %v180_v13 = vld [vmem:[%s1765_s2 + $0x10] sm:$0xff] }
  0x3e   :  { %v199_v21 = vld [vmem:[%s1765_s2 + $0xa8] sm:$0xff]  ;;  %1079 = vmatpush1.bf16.msra.mxu1 %v1078_v16  ;;  %v1082_v22 = vpack.c.bf16 %v190_v19, %v186_v18  ;;  %v194_v24 = vld [vmem:[%s1765_s2 + $0x80] sm:$0xff]  ;;  %v184_v14 = vld [vmem:[%s1765_s2 + $0x30] sm:$0xff]  ;;  %p1387_p13 = por %p1386_p12, %p1385_p11 }
  0x3f   :  { %1075 = vmatpush3.bf16.msra.mxu0 %v1074_v7  ;;  %1081 = vmatprep.subr.bf16.mxu1 %v1080_v17  ;;  %v1084_v23 = vpack.c.bf16 %v199_v21, %v195_v20  ;;  %v198_v25 = vld [vmem:[%s1765_s2 + $0xa0] sm:$0xff]  ;;  %v203_v26 = vld [vmem:[%s1765_s2 + $0xc8] sm:$0xff]  ;;  %v189_v16 = vld [vmem:[%s1765_s2 + $0x58] sm:$0xff]  ;;  %v1094_v19 = vpack.c.bf16 %v184_v14, %v180_v13 }
  0x40   :  { %v207_v27 = vld [vmem:[%s1765_s2 + $0xe8] sm:$0xff]  ;;  %v1086_v28 = vpack.c.bf16 %v198_v25, %v194_v24  ;;  %v202_v30 = vld [vmem:[%s1765_s2 + $0xc0] sm:$0xff]  ;;  %v193_v17 = vld [vmem:[%s1765_s2 + $0x78] sm:$0xff]  ;;  %p1388_p0 = pnand %p1387_p13, %p1381_p10 }
  0x41   :  { %v1088_v29 = vpack.c.bf16 %v207_v27, %v203_v26  ;;  %v206_v31 = vld [vmem:[%s1765_s2 + $0xe0] sm:$0xff]  ;;  %v522_v36 = vld [vmem:[#allocation5 + $0x8] sm:$0xff]  ;;  %v1096_v21 = vpack.c.bf16 %v193_v17, %v189_v16  ;;  %v197_v24 = vld [vmem:[%s1765_s2 + $0x98] sm:$0xff] }
  0x42   :  { %1068 = vmatmul.mubr.msk.f32.vlgmr.msra.gmra.mrb[0].mxu0 %vm69_vm1, %v63_v8  ;;  %1083 = vmatpush1.bf16.msra.mxu1 %v1082_v22  ;;  %v1090_v34 = vpack.c.bf16 %v206_v31, %v202_v30  ;;  %v521_v38 = vld [vmem:[#allocation5] sm:$0xff]  ;;  %v1108_v39 = vpack.c.bf16 %v524_v37, %v522_v36  ;;  %v188_v22 = vld [vmem:[%s1765_s2 + $0x50] sm:$0xff]  ;;  %v201_v25 = vld [vmem:[%s1765_s2 + $0xb8] sm:$0xff] }
  0x43   :  { %1085 = vmatprep.subr.bf16.mxu1 %v1084_v23  ;;  %v1110_v41 = vpack.c.bf16 %v523_v40, %v521_v38  ;;  %v68_v42 = vld [vmem:[#allocation7] ss:$0 sm:$0xff]  ;;  %v149_v11 = vld [vmem:[#allocation7 + $0x1] ss:$0 sm:$0xff]  ;;  %v150_v15 = vld [vmem:[#allocation7 + $0x2] ss:$0 sm:$0xff]  ;;  %v1100_v27 = vpack.c.bf16 %v201_v25, %v197_v24 }
  0x44   :  { %1109 = vmatprep.subr.bf16.mxu0 %v1108_v39  ;;  %v192_v23 = vld [vmem:[%s1765_s2 + $0x70] sm:$0xff]  ;;  %v205_v30 = vld [vmem:[%s1765_s2 + $0xd8] sm:$0xff]  ;;  %v526_v36 = vld [vmem:[#allocation5 + $0x28] sm:$0xff] }
  0x45   :  { %1111 = vmatpush1.bf16.msra.mxu0 %v1110_v41  ;;  %v1098_v26 = vpack.c.bf16 %v192_v23, %v188_v22  ;;  %v209_v31 = vld [vmem:[%s1765_s2 + $0xf8] sm:$0xff]  ;;  %v204_v33 = vld [vmem:[%s1765_s2 + $0xd0] sm:$0xff]  ;;  %v525_v39 = vld [vmem:[#allocation5 + $0x20] sm:$0xff] }
  0x46   :  { %1087 = vmatpush1.bf16.msra.mxu1 %v1086_v28  ;;  %v196_v28 = vld [vmem:[%s1765_s2 + $0x90] sm:$0xff]  ;;  %v1104_v32 = vpack.c.bf16 %v209_v31, %v205_v30  ;;  %v528_v37 = vld [vmem:[#allocation5 + $0x38] sm:$0xff]  ;;  %v545_v23 = vld [vmem:[#allocation5 + $0xc0] sm:$0xff] }
  0x47   :  { %1089 = vmatprep.subr.bf16.mxu1 %v1088_v29  ;;  %v200_v29 = vld [vmem:[%s1765_s2 + $0xb0] sm:$0xff]  ;;  %v1112_v38 = vpack.c.bf16 %v528_v37, %v526_v36  ;;  %v596_v16 = vld [vmem:[#allocation5 + $0x258] sm:$0xff]  ;;  %v550_v30 = vld [vmem:[#allocation5 + $0xe8] sm:$0xff] }
  0x48   :  { %v527_v40 = vld [vmem:[#allocation5 + $0x30] sm:$0xff]  ;;  %v552_v31 = vld [vmem:[#allocation5 + $0xf8] sm:$0xff] }
  0x49   :  { %v1114_v41 = vpack.c.bf16 %v527_v40, %v525_v39  ;;  %1113 = vmatprep.subr.bf16.mxu0 %v1112_v38  ;;  %v595_v22 = vld [vmem:[#allocation5 + $0x250] sm:$0xff]  ;;  %v602_v38 = vld [vmem:[#allocation5 + $0x288] sm:$0xff]  ;;  %v604_v39 = vld [vmem:[#allocation5 + $0x298] sm:$0xff] }
  0x4a   :  { %1091 = vmatpush1.bf16.msra.mxu1 %v1090_v34  ;;  %v208_v34 = vld [vmem:[%s1765_s2 + $0xf0] sm:$0xff]  ;;  %v1188_v40 = vpack.c.bf16 %v604_v39, %v602_v38  ;;  %v576_v38 = vld [vmem:[#allocation5 + $0x1b8] sm:$0xff]  ;;  %v621_v39 = vld [vmem:[#allocation5 + $0x320] sm:$0xff] }
  0x4b   :  { %1093 = vmatprep.subr.bf16.mxu1 %v1092_v35  ;;  %v1106_v35 = vpack.c.bf16 %v208_v34, %v204_v33  ;;  %1115 = vmatpush1.bf16.msra.mxu0 %v1114_v41  ;;  %v547_v24 = vld [vmem:[#allocation5 + $0xd0] sm:$0xff]  ;;  %v549_v34 = vld [vmem:[#allocation5 + $0xe0] sm:$0xff]  ;;  %v554_v41 = vld [vmem:[#allocation5 + $0x108] sm:$0xff] }
  0x4c   :  { %v599_v33 = vld [vmem:[#allocation5 + $0x270] sm:$0xff] }
 0x115   :  { %v139_v43 = vpop.f32.mrb[0].mxu0 }
 0x116   :  { %v140_v44 = vadd.f32 %v139_v43, %v68_v42  ;;  %v1069_v45 = vpop.f32.mrb[1].mxu0  ;;  %v530_v42 = vld [vmem:[#allocation5 + $0x48] sm:$0xff]  ;;  %v532_v43 = vld [vmem:[#allocation5 + $0x58] sm:$0xff] }
 0x117   :  { %v529_v45 = vld [vmem:[#allocation5 + $0x40] sm:$0xff] }
 0x118   :  { %v144_v46 = vmin.f32 %v140_v44, 0.0  ;;  %vm143_vm3 = vcmp.gt.f32.partialorder %v140_v44, 0.0 }
 0x11a   :  { %v145_v47 = vmul.f32 1.442695, %v144_v46  ;;  %v531_v46 = vld [vmem:[#allocation5 + $0x50] sm:$0xff] }
 0x11c   :  { %1282 = vpow2.f32 %v145_v47  ;;  %v1118_v47 = vpack.c.bf16 %v531_v46, %v529_v45  ;;  %v603_v45 = vld [vmem:[#allocation5 + $0x290] sm:$0xff]  ;;  %v553_v46 = vld [vmem:[#allocation5 + $0x100] sm:$0xff] }
 0x126   :  { %v1283_v48 = vpop.eup %1282 }
 0x127   :  { %v1010_v49 = vadd.f32 -1.0, %v1283_v48  ;;  %v534_v48 = vld [vmem:[#allocation5 + $0x68] sm:$0xff] }
 0x129   :  { %v148_v50 = vsel %vm143_vm3, %v140_v44, %v1010_v49  ;;  %v1116_v44 = vpack.c.bf16 %v532_v43, %v530_v42  ;;  %v536_v49 = vld [vmem:[#allocation5 + $0x78] sm:$0xff]  ;;  %v601_v43 = vld [vmem:[#allocation5 + $0x280] sm:$0xff] }
 0x12a   :  { %v159_v51 = vmul.f32 %v148_v50, %v148_v50  ;;  %v152_v52 = vsel %vm151_vm2, %v148_v50, 0.0  ;;  %v556_v42 = vld [vmem:[#allocation5 + $0x118] sm:$0xff] }
 0x12b   :  { %v153_v53 = vrot.slane %v152_v52, 4  ;;  %1117 = vmatprep.subr.bf16.mxu0 %v1116_v44  ;;  %v1140_v44 = vpack.c.bf16 %v556_v42, %v554_v41  ;;  %v623_v41 = vld [vmem:[#allocation5 + $0x330] sm:$0xff]  ;;  %v573_v42 = vld [vmem:[#allocation5 + $0x1a0] sm:$0xff] }
 0x12c   :  { %v160_v54 = vsel %vm151_vm2, %v159_v51, 0.0  ;;  %1119 = vmatpush1.bf16.msra.mxu0 %v1118_v47  ;;  %v533_v51 = vld [vmem:[#allocation5 + $0x60] sm:$0xff]  ;;  %v555_v47 = vld [vmem:[#allocation5 + $0x110] sm:$0xff] }
 0x12d   :  { %v154_v55 = vadd.f32 %v153_v53, %v152_v52  ;;  %v161_v56 = vrot.slane %v160_v54, 4  ;;  %v535_v52 = vld [vmem:[#allocation5 + $0x70] sm:$0xff] }
 0x12e   :  { %v1122_v53 = vpack.c.bf16 %v535_v52, %v533_v51  ;;  %v608_v51 = vld [vmem:[#allocation5 + $0x2b8] sm:$0xff] }
 0x12f   :  { %v155_v57 = vrot.slane %v154_v55, 2  ;;  %v162_v58 = vadd.f32 %v161_v56, %v160_v54  ;;  %v586_v54 = vld [vmem:[#allocation5 + $0x208] sm:$0xff] }
 0x131   :  { %v156_v59 = vadd.f32 %v155_v57, %v154_v55  ;;  %v163_v60 = vrot.slane %v162_v58, 2  ;;  %v588_v55 = vld [vmem:[#allocation5 + $0x218] sm:$0xff]  ;;  %v538_v57 = vld [vmem:[#allocation5 + $0x88] sm:$0xff] }
 0x132   :  { %v1172_v56 = vpack.c.bf16 %v588_v55, %v586_v54  ;;  %v560_v54 = vld [vmem:[#allocation5 + $0x138] sm:$0xff]  ;;  %v605_v55 = vld [vmem:[#allocation5 + $0x2a0] sm:$0xff] }
 0x133   :  { %v157_v61 = vrot.slane %v156_v59, 1  ;;  %v164_v62 = vadd.f32 %v163_v60, %v162_v58  ;;  %v540_v58 = vld [vmem:[#allocation5 + $0x98] sm:$0xff] }
 0x134   :  { %v1124_v60 = vpack.c.bf16 %v540_v58, %v538_v57  ;;  %v607_v57 = vld [vmem:[#allocation5 + $0x2b0] sm:$0xff]  ;;  %v557_v58 = vld [vmem:[#allocation5 + $0x120] sm:$0xff] }
 0x135   :  { %v158_v63 = vadd.f32 %v157_v61, %v156_v59  ;;  %v165_v0 = vrot.slane %v164_v62, 1  ;;  %v585_v59 = vld [vmem:[#allocation5 + $0x200] sm:$0xff]  ;;  %v587_v61 = vld [vmem:[#allocation5 + $0x210] sm:$0xff] }
 0x137   :  { %v166_v2 = vadd.f32 %v165_v0, %v164_v62  ;;  %v167_v3 = vmul.f32 0.125, %v158_v63  ;;  %v537_v62 = vld [vmem:[#allocation5 + $0x80] sm:$0xff]  ;;  %v539_v63 = vld [vmem:[#allocation5 + $0x90] sm:$0xff]  ;;  %v1174_v0 = vpack.c.bf16 %v587_v61, %v585_v59 }
 0x138   :  { %v559_v59 = vld [vmem:[#allocation5 + $0x130] sm:$0xff] }
 0x139   :  { %v168_v4 = vmul.f32 0.125, %v166_v2  ;;  %v169_v5 = vmul.f32 %v167_v3, %v167_v3  ;;  %v172_v9 = vsub.f32 %v148_v50, %v167_v3  ;;  %v1120_v50 = vpack.c.bf16 %v536_v49, %v534_v48  ;;  %v590_v3 = vld [vmem:[#allocation5 + $0x228] sm:$0xff] }
 0x13a   :  { %v1126_v2 = vpack.c.bf16 %v539_v63, %v537_v62  ;;  %v1190_v48 = vpack.c.bf16 %v603_v45, %v601_v43  ;;  %v1142_v49 = vpack.c.bf16 %v555_v47, %v553_v46  ;;  %v1146_v61 = vpack.c.bf16 %v559_v59, %v557_v58  ;;  %v610_v62 = vld [vmem:[#allocation5 + $0x2c8] sm:$0xff]  ;;  %v612_v63 = vld [vmem:[#allocation5 + $0x2d8] sm:$0xff]  ;;  %v575_v43 = vld [vmem:[#allocation5 + $0x1b0] sm:$0xff] }
 0x13b   :  { %v170_v6 = vsub.f32 %v168_v4, %v169_v5  ;;  %1121 = vmatprep.subr.bf16.mxu0 %v1120_v50  ;;  %v592_v4 = vld [vmem:[#allocation5 + $0x238] sm:$0xff]  ;;  %v606_v50 = vld [vmem:[#allocation5 + $0x2a8] sm:$0xff]  ;;  %v1162_v45 = vpack.c.bf16 %v575_v43, %v573_v42 }
 0x13c   :  { %1123 = vmatpush1.bf16.msra.mxu0 %v1122_v53  ;;  %v1176_v5 = vpack.c.bf16 %v592_v4, %v590_v3  ;;  %v1192_v52 = vpack.c.bf16 %v608_v51, %v606_v50  ;;  %v558_v53 = vld [vmem:[#allocation5 + $0x128] sm:$0xff]  ;;  %v564_v3 = vld [vmem:[#allocation5 + $0x158] sm:$0xff]  ;;  %v609_v4 = vld [vmem:[#allocation5 + $0x2c0] sm:$0xff] }
 0x13d   :  { %v171_v7 = vmax.f32 %v170_v6, 0.0  ;;  %1125 = vmatprep.subr.bf16.mxu0 %v1124_v60  ;;  %v542_v6 = vld [vmem:[#allocation5 + $0xa8] sm:$0xff]  ;;  %v1194_v60 = vpack.c.bf16 %v607_v57, %v605_v55  ;;  %v628_v47 = vld [vmem:[#allocation5 + $0x358] sm:$0xff]  ;;  %v625_v51 = vld [vmem:[#allocation5 + $0x340] sm:$0xff] }
 0x13e   :  { %v626_v46 = vld [vmem:[#allocation5 + $0x348] sm:$0xff]  ;;  %v580_v50 = vld [vmem:[#allocation5 + $0x1d8] sm:$0xff]  ;;  %v579_v55 = vld [vmem:[#allocation5 + $0x1d0] sm:$0xff] }
 0x13f   :  { %v173_v8 = vadd.f32 1e-05, %v171_v7  ;;  %v544_v7 = vld [vmem:[#allocation5 + $0xb8] sm:$0xff]  ;;  %v630_v58 = vld [vmem:[#allocation5 + $0x368] sm:$0xff] }
 0x140   :  { %1127 = vmatpush1.bf16.msra.mxu0 %v1126_v2  ;;  %v562_v2 = vld [vmem:[#allocation5 + $0x148] sm:$0xff]  ;;  %v632_v59 = vld [vmem:[#allocation5 + $0x378] sm:$0xff] }
 0x141   :  { %1284 = vrsqrt.f32 %v173_v8  ;;  %v589_v8 = vld [vmem:[#allocation5 + $0x220] sm:$0xff] }
 0x14b   :  { %v1285_v10 = vpop.eup %1284 }
 0x14c   :  { %v175_v12 = vmul.f32 %v1285_v10, %v172_v9  ;;  %v1128_v9 = vpack.c.bf16 %v544_v7, %v542_v6  ;;  %v591_v10 = vld [vmem:[#allocation5 + $0x230] sm:$0xff]  ;;  %v561_v7 = vld [vmem:[#allocation5 + $0x140] sm:$0xff] }
 0x14d   :  { %v1178_v13 = vpack.c.bf16 %v591_v10, %v589_v8  ;;  %v611_v6 = vld [vmem:[#allocation5 + $0x2d0] sm:$0xff] }
 0x14e   :  { %v176_v18 = vmul.f32 %v175_v12, %v149_v11  ;;  %v541_v11 = vld [vmem:[#allocation5 + $0xa0] sm:$0xff]  ;;  %v543_v12 = vld [vmem:[#allocation5 + $0xb0] sm:$0xff]  ;;  %1129 = vmatprep.subr.bf16.mxu0 %v1128_v9  ;;  %v1198_v9 = vpack.c.bf16 %v611_v6, %v609_v4 }
 0x14f   :  { %v1130_v14 = vpack.c.bf16 %v543_v12, %v541_v11  ;;  %v563_v8 = vld [vmem:[#allocation5 + $0x150] sm:$0xff]  ;;  %v614_v11 = vld [vmem:[#allocation5 + $0x2e8] sm:$0xff]  ;;  %v616_v12 = vld [vmem:[#allocation5 + $0x2f8] sm:$0xff] }
 0x150   :  { %v177_v20 = vadd.f32 %v176_v18, %v150_v15  ;;  %v594_v15 = vld [vmem:[#allocation5 + $0x248] sm:$0xff]  ;;  %v1150_v10 = vpack.c.bf16 %v563_v8, %v561_v7  ;;  %v581_v4 = vld [vmem:[#allocation5 + $0x1e0] sm:$0xff]  ;;  %v636_v8 = vld [vmem:[#allocation5 + $0x398] sm:$0xff] }
 0x151   :  { %1131 = vmatpush1.bf16.msra.mxu0 %v1130_v14  ;;  %v1180_v17 = vpack.c.bf16 %v596_v16, %v594_v15  ;;  %v546_v18 = vld [vmem:[#allocation5 + $0xc8] sm:$0xff]  ;;  %v568_v15 = vld [vmem:[#allocation5 + $0x178] sm:$0xff]  ;;  %v613_v16 = vld [vmem:[#allocation5 + $0x2e0] sm:$0xff] }
 0x152   :  { %1011 = vmatmul.mubr.msk.f32.vlgmr.msra.gmra.mrb[0].mxu1 %vm151_vm2, %v177_v20  ;;  %986 = vst.msk [vmem:[#allocation8] sm:$0xff] %vm151_vm2, %v177_v20  ;;  %v566_v14 = vld [vmem:[#allocation5 + $0x168] sm:$0xff] }
 0x153   :  { %1095 = vmatpush1.bf16.msra.mxu1 %v1094_v19  ;;  %348 = vmatprep.mubr.f32.mxu1 %v1417_v1  ;;  %v1102_v1 = vpack.c.bf16 %v200_v29, %v196_v28  ;;  %v548_v19 = vld [vmem:[#allocation5 + $0xd8] sm:$0xff]  ;;  %v634_v7 = vld [vmem:[#allocation5 + $0x388] sm:$0xff] }
 0x154   :  { %1097 = vmatprep.subr.bf16.mxu1 %v1096_v21  ;;  %v1132_v21 = vpack.c.bf16 %v548_v19, %v546_v18  ;;  %v600_v28 = vld [vmem:[#allocation5 + $0x278] sm:$0xff]  ;;  %v615_v18 = vld [vmem:[#allocation5 + $0x2f0] sm:$0xff]  ;;  %v565_v19 = vld [vmem:[#allocation5 + $0x160] sm:$0xff] }
 0x156   :  { %1133 = vmatprep.subr.bf16.mxu0 %v1132_v21  ;;  %v1202_v21 = vpack.c.bf16 %v615_v18, %v613_v16  ;;  %v642_v18 = vld [vmem:[#allocation5 + $0x3c8] sm:$0xff] }
 0x157   :  { %1099 = vmatpush1.bf16.msra.mxu1 %v1098_v26  ;;  %v1134_v26 = vpack.c.bf16 %v547_v24, %v545_v23  ;;  %v618_v23 = vld [vmem:[#allocation5 + $0x308] sm:$0xff]  ;;  %v620_v24 = vld [vmem:[#allocation5 + $0x318] sm:$0xff] }
 0x158   :  { %1101 = vmatprep.subr.bf16.mxu1 %v1100_v27  ;;  %v598_v27 = vld [vmem:[#allocation5 + $0x268] sm:$0xff] }
 0x159   :  { %1135 = vmatpush1.bf16.msra.mxu0 %v1134_v26  ;;  %v1184_v29 = vpack.c.bf16 %v600_v28, %v598_v27  ;;  %v570_v26 = vld [vmem:[#allocation5 + $0x188] sm:$0xff]  ;;  %v572_v27 = vld [vmem:[#allocation5 + $0x198] sm:$0xff]  ;;  %v617_v28 = vld [vmem:[#allocation5 + $0x300] sm:$0xff] }
 0x15b   :  { %1103 = vmatpush1.bf16.msra.mxu1 %v1102_v1  ;;  %v597_v1 = vld [vmem:[#allocation5 + $0x260] sm:$0xff] }
 0x15c   :  { %1105 = vmatprep.subr.bf16.mxu1 %v1104_v32  ;;  %v1136_v32 = vpack.c.bf16 %v552_v31, %v550_v30  ;;  %v1186_v36 = vpack.c.bf16 %v599_v33, %v597_v1  ;;  %v619_v30 = vld [vmem:[#allocation5 + $0x310] sm:$0xff]  ;;  %v569_v31 = vld [vmem:[#allocation5 + $0x180] sm:$0xff] }
 0x15d   :  { %v571_v1 = vld [vmem:[#allocation5 + $0x190] sm:$0xff] }
 0x15e   :  { %1137 = vmatprep.subr.bf16.mxu0 %v1136_v32  ;;  %v1206_v32 = vpack.c.bf16 %v619_v30, %v617_v28  ;;  %v1158_v33 = vpack.c.bf16 %v571_v1, %v569_v31  ;;  %v645_v28 = vld [vmem:[#allocation5 + $0x3e0] sm:$0xff] }
 0x15f   :  { %1107 = vmatpush1.bf16.msra.mxu1 %v1106_v35  ;;  %v551_v35 = vld [vmem:[#allocation5 + $0xf0] sm:$0xff] }
 0x160   :  { %1173 = vmatprep.subr.bf16.mxu1 %v1172_v56  ;;  %v1138_v37 = vpack.c.bf16 %v551_v35, %v549_v34  ;;  %v1144_v56 = vpack.c.bf16 %v560_v54, %v558_v53  ;;  %v622_v34 = vld [vmem:[#allocation5 + $0x328] sm:$0xff]  ;;  %v624_v35 = vld [vmem:[#allocation5 + $0x338] sm:$0xff]  ;;  %v627_v53 = vld [vmem:[#allocation5 + $0x350] sm:$0xff] }
 0x161   :  { %v577_v54 = vld [vmem:[#allocation5 + $0x1c0] sm:$0xff] }
 0x162   :  { %1012 = vmatmul.mubr.msk.f32.vlgmr.msra.gmra.mrb[2].mxu1 %vm151_vm2, %v177_v20  ;;  %v593_v20 = vld [vmem:[#allocation5 + $0x240] sm:$0xff]  ;;  %1139 = vmatpush1.bf16.msra.mxu0 %v1138_v37  ;;  %v574_v37 = vld [vmem:[#allocation5 + $0x1a8] sm:$0xff]  ;;  %v1166_v57 = vpack.c.bf16 %v579_v55, %v577_v54 }
 0x163   :  { %1175 = vmatpush1.bf16.msra.mxu1 %v1174_v0  ;;  %v1182_v25 = vpack.c.bf16 %v595_v22, %v593_v20  ;;  %1141 = vmatprep.subr.bf16.mxu0 %v1140_v44  ;;  %v1196_v0 = vpack.c.bf16 %v612_v63, %v610_v62  ;;  %v567_v20 = vld [vmem:[#allocation5 + $0x170] sm:$0xff]  ;;  %v1210_v44 = vpack.c.bf16 %v623_v41, %v621_v39  ;;  %v584_v62 = vld [vmem:[#allocation5 + $0x1f8] sm:$0xff]  ;;  %v629_v63 = vld [vmem:[#allocation5 + $0x360] sm:$0xff] }
 0x164   :  { %1177 = vmatprep.subr.bf16.mxu1 %v1176_v5  ;;  %v1148_v5 = vpack.c.bf16 %v564_v3, %v562_v2  ;;  %v1154_v22 = vpack.c.bf16 %v567_v20, %v565_v19  ;;  %v644_v19 = vld [vmem:[#allocation5 + $0x3d8] sm:$0xff] }
 0x166   :  { %1143 = vmatpush1.bf16.msra.mxu0 %v1142_v49  ;;  %v578_v49 = vld [vmem:[#allocation5 + $0x1c8] sm:$0xff] }
 0x167   :  { %1179 = vmatpush1.bf16.msra.mxu1 %v1178_v13  ;;  %1145 = vmatprep.subr.bf16.mxu0 %v1144_v56  ;;  %v1200_v13 = vpack.c.bf16 %v616_v12, %v614_v11  ;;  %v1214_v56 = vpack.c.bf16 %v627_v53, %v625_v51  ;;  %v635_v11 = vld [vmem:[#allocation5 + $0x390] sm:$0xff] }
 0x168   :  { %1181 = vmatprep.subr.bf16.mxu1 %v1180_v17  ;;  %v1152_v17 = vpack.c.bf16 %v568_v15, %v566_v14  ;;  %v640_v14 = vld [vmem:[#allocation5 + $0x3b8] sm:$0xff]  ;;  %v637_v15 = vld [vmem:[#allocation5 + $0x3a0] sm:$0xff] }
 0x16a   :  { %1147 = vmatpush1.bf16.msra.mxu0 %v1146_v61  ;;  %v1216_v61 = vpack.c.bf16 %v632_v59, %v630_v58 }
 0x16b   :  { %1183 = vmatpush1.bf16.msra.mxu1 %v1182_v25  ;;  %1149 = vmatprep.subr.bf16.mxu0 %v1148_v5  ;;  %v1204_v25 = vpack.c.bf16 %v620_v24, %v618_v23  ;;  %v583_v5 = vld [vmem:[#allocation5 + $0x1f0] sm:$0xff]  ;;  %v646_v24 = vld [vmem:[#allocation5 + $0x3e8] sm:$0xff] }
 0x16c   :  { %1185 = vmatprep.subr.bf16.mxu1 %v1184_v29  ;;  %v1156_v29 = vpack.c.bf16 %v572_v27, %v570_v26  ;;  %v1170_v6 = vpack.c.bf16 %v583_v5, %v581_v4  ;;  %v643_v23 = vld [vmem:[#allocation5 + $0x3d0] sm:$0xff] }
 0x16e   :  { %1151 = vmatpush1.bf16.msra.mxu0 %v1150_v10  ;;  %v633_v10 = vld [vmem:[#allocation5 + $0x380] sm:$0xff] }
 0x16f   :  { %1187 = vmatpush1.bf16.msra.mxu1 %v1186_v36  ;;  %1153 = vmatprep.subr.bf16.mxu0 %v1152_v17  ;;  %v1208_v36 = vpack.c.bf16 %v624_v35, %v622_v34  ;;  %v1222_v12 = vpack.c.bf16 %v635_v11, %v633_v10  ;;  %v639_v17 = vld [vmem:[#allocation5 + $0x3b0] sm:$0xff] }
 0x170   :  { %1189 = vmatprep.subr.bf16.mxu1 %v1188_v40  ;;  %v1160_v40 = vpack.c.bf16 %v576_v38, %v574_v37  ;;  %v1226_v20 = vpack.c.bf16 %v639_v17, %v637_v15 }
 0x172   :  { %1155 = vmatpush1.bf16.msra.mxu0 %v1154_v22  ;;  %v641_v22 = vld [vmem:[#allocation5 + $0x3c0] sm:$0xff] }
 0x173   :  { %1191 = vmatpush1.bf16.msra.mxu1 %v1190_v48  ;;  %1157 = vmatprep.subr.bf16.mxu0 %v1156_v29  ;;  %v1212_v48 = vpack.c.bf16 %v628_v47, %v626_v46  ;;  %v1230_v26 = vpack.c.bf16 %v643_v23, %v641_v22  ;;  %v647_v29 = vld [vmem:[#allocation5 + $0x3f0] sm:$0xff] }
 0x174   :  { %1193 = vmatprep.subr.bf16.mxu1 %v1192_v52  ;;  %v1164_v52 = vpack.c.bf16 %v580_v50, %v578_v49  ;;  %v1234_v30 = vpack.c.bf16 %v647_v29, %v645_v28 }
 0x176   :  { %1159 = vmatpush1.bf16.msra.mxu0 %v1158_v33 }
 0x177   :  { %1195 = vmatpush1.bf16.msra.mxu1 %v1194_v60  ;;  %1161 = vmatprep.subr.bf16.mxu0 %v1160_v40  ;;  %v582_v60 = vld [vmem:[#allocation5 + $0x1e8] sm:$0xff] }
 0x178   :  { %1197 = vmatprep.subr.bf16.mxu1 %v1196_v0  ;;  %v631_v0 = vld [vmem:[#allocation5 + $0x370] sm:$0xff]  ;;  %v1168_v2 = vpack.c.bf16 %v584_v62, %v582_v60 }
 0x179   :  { %v1218_v3 = vpack.c.bf16 %v631_v0, %v629_v63 }
 0x17a   :  { %1163 = vmatpush1.bf16.msra.mxu0 %v1162_v45 }
 0x17b   :  { %1199 = vmatpush1.bf16.msra.mxu1 %v1198_v9  ;;  %1165 = vmatprep.subr.bf16.mxu0 %v1164_v52  ;;  %v1220_v9 = vpack.c.bf16 %v636_v8, %v634_v7 }
 0x17c   :  { %1201 = vmatprep.subr.bf16.mxu1 %v1200_v13  ;;  %v638_v13 = vld [vmem:[#allocation5 + $0x3a8] sm:$0xff] }
 0x17d   :  { %v1224_v16 = vpack.c.bf16 %v640_v14, %v638_v13 }
 0x17e   :  { %1167 = vmatpush1.bf16.msra.mxu0 %v1166_v57 }
 0x17f   :  { %1203 = vmatpush1.bf16.msra.mxu1 %v1202_v21  ;;  %1169 = vmatprep.subr.bf16.mxu0 %v1168_v2  ;;  %v1228_v21 = vpack.c.bf16 %v644_v19, %v642_v18 }
 0x180   :  { %1205 = vmatprep.subr.bf16.mxu1 %v1204_v25  ;;  %v648_v25 = vld [vmem:[#allocation5 + $0x3f8] sm:$0xff] }
 0x181   :  { %v1232_v27 = vpack.c.bf16 %v648_v25, %v646_v24 }
 0x182   :  { %1171 = vmatpush1.bf16.msra.mxu0 %v1170_v6 }
 0x183   :  { %1207 = vmatpush1.bf16.msra.mxu1 %v1206_v32 }
 0x184   :  { %1209 = vmatprep.subr.bf16.mxu1 %v1208_v36 }
 0x187   :  { %1211 = vmatpush1.bf16.msra.mxu1 %v1210_v44 }
 0x188   :  { %1213 = vmatprep.subr.bf16.mxu1 %v1212_v48 }
 0x18b   :  { %1215 = vmatpush1.bf16.msra.mxu1 %v1214_v56 }
 0x18c   :  { %1217 = vmatprep.subr.bf16.mxu1 %v1216_v61 }
 0x18f   :  { %1219 = vmatpush1.bf16.msra.mxu1 %v1218_v3 }
 0x190   :  { %1221 = vmatprep.subr.bf16.mxu1 %v1220_v9 }
 0x193   :  { %1223 = vmatpush1.bf16.msra.mxu1 %v1222_v12  ;;  %v448_v12 = vlaneseq }
 0x194   :  { %1225 = vmatprep.subr.bf16.mxu1 %v1224_v16 }
 0x195   :  { %v1631_v24 = vshrl.u32 %v448_v12, 7 }
 0x197   :  { %1227 = vmatpush1.bf16.msra.mxu1 %v1226_v20 }
 0x198   :  { %1229 = vmatprep.subr.bf16.mxu1 %v1228_v21 }
 0x19b   :  { %1231 = vmatpush1.bf16.msra.mxu1 %v1230_v26 }
 0x19c   :  { %1233 = vmatprep.subr.bf16.mxu1 %v1232_v27 }
 0x19f   :  { %1235 = vmatpush1.bf16.msra.mxu1 %v1234_v30 }
 0x225   :  { %v1599_v31 = vpop.f32.mrb[0].mxu1 }
 0x226   :  { %v359_v1 = vrot.slane %v1599_v31, 4  ;;  %v383_v32 = vmul.f32 %v1599_v31, %v1599_v31  ;;  %v1604_v33 = vpop.f32.mrb[1].mxu1 }
 0x227   :  { %v365_v34 = vrot.slane %v1604_v33, 4  ;;  %v384_v35 = vmul.f32 %v1604_v33, %v1604_v33 }
 0x228   :  { %v360_v36 = vadd.f32 %v359_v1, %v1599_v31  ;;  %v387_v37 = vrot.slane %v383_v32, 4 }
 0x229   :  { %v366_v38 = vadd.f32 %v365_v34, %v1604_v33  ;;  %v393_v39 = vrot.slane %v384_v35, 4  ;;  %v1634_v34 = vsub.s32 0, %v1631_v24 }
 0x22a   :  { %v361_v40 = vrot.slane %v360_v36, 2  ;;  %v388_v41 = vadd.f32 %v387_v37, %v383_v32  ;;  %v356_v37 = vld [vmem:[#allocation7 + $0x3] ss:$8 sm:$0xf] }
 0x22b   :  { %v367_v42 = vrot.slane %v366_v38, 2  ;;  %v394_v43 = vadd.f32 %v393_v39, %v384_v35 }
 0x22c   :  { %v362_v44 = vadd.f32 %v361_v40, %v360_v36  ;;  %v389_v45 = vrot.slane %v388_v41, 2  ;;  %v1637_v40 = vsub.s32 1, %v1631_v24 }
 0x22d   :  { %v368_v46 = vadd.f32 %v367_v42, %v366_v38  ;;  %v395_v47 = vrot.slane %v394_v43, 2 }
 0x22e   :  { %v363_v48 = vrot.slane %v362_v44, 1  ;;  %v390_v49 = vadd.f32 %v389_v45, %v388_v41  ;;  %v358_v45 = vld [vmem:[#allocation7 + $0x4] ss:$8 sm:$0xf] }
 0x22f   :  { %v369_v50 = vrot.slane %v368_v46, 1  ;;  %v396_v51 = vadd.f32 %v395_v47, %v394_v43  ;;  %v451_v47 = vrot.slane %v356_v37, %v1634_v34 }
 0x230   :  { %v364_v52 = vadd.f32 %v363_v48, %v362_v44  ;;  %v391_v53 = vrot.slane %v390_v49, 1 }
 0x231   :  { %v370_v54 = vadd.f32 %v369_v50, %v368_v46  ;;  %v397_v55 = vrot.slane %v396_v51, 1 }
 0x232   :  { %v392_v56 = vadd.f32 %v391_v53, %v390_v49  ;;  %v1611_v57 = vmul.f32 0.125, %v364_v52  ;;  %v455_v53 = vrot.slane %v356_v37, %v1637_v40 }
 0x233   :  { %v398_v58 = vadd.f32 %v397_v55, %v396_v51  ;;  %v1613_v59 = vmul.f32 0.125, %v370_v54 }
 0x234   :  { %v415_v60 = vmul.f32 0.125, %v392_v56  ;;  %v419_v61 = vmul.f32 %v1611_v57, %v1611_v57  ;;  %v431_v46 = vsub.f32 %v1599_v31, %v1611_v57  ;;  %v480_v31 = vrot.slane %v358_v45, %v1637_v40 }
 0x235   :  { %v416_v62 = vmul.f32 0.125, %v398_v58  ;;  %v420_v63 = vmul.f32 %v1613_v59, %v1613_v59  ;;  %v1619_v0 = vpop.f32.mrb[2].mxu1  ;;  %v432_v51 = vsub.f32 %v1604_v33, %v1613_v59  ;;  %v476_v58 = vrot.slane %v358_v45, %v1634_v34 }
 0x236   :  { %v423_v2 = vsub.f32 %v415_v60, %v419_v61  ;;  %v371_v3 = vrot.slane %v1619_v0, 4  ;;  %v385_v4 = vmul.f32 %v1619_v0, %v1619_v0  ;;  %v1624_v5 = vpop.f32.mrb[3].mxu1 }
 0x237   :  { %v424_v6 = vsub.f32 %v416_v62, %v420_v63  ;;  %v377_v7 = vrot.slane %v1624_v5, 4  ;;  %v386_v8 = vmul.f32 %v1624_v5, %v1624_v5 }
 0x238   :  { %v427_v9 = vmax.f32 %v423_v2, 0.0  ;;  %v372_v10 = vadd.f32 %v371_v3, %v1619_v0  ;;  %v399_v11 = vrot.slane %v385_v4, 4 }
 0x239   :  { %v428_v13 = vmax.f32 %v424_v6, 0.0  ;;  %v378_v14 = vadd.f32 %v377_v7, %v1624_v5  ;;  %v405_v15 = vrot.slane %v386_v8, 4 }
 0x23a   :  { %v435_v16 = vadd.f32 1e-05, %v427_v9  ;;  %v373_v17 = vrot.slane %v372_v10, 2  ;;  %v400_v18 = vadd.f32 %v399_v11, %v385_v4  ;;  %v458_v9 = vsub.s32 2, %v1631_v24 }
 0x23b   :  { %v436_v19 = vadd.f32 1e-05, %v428_v13  ;;  %v379_v20 = vrot.slane %v378_v14, 2  ;;  %v406_v21 = vadd.f32 %v405_v15, %v386_v8 }
 0x23c   :  { %1286 = vrsqrt.f32 %v435_v16  ;;  %v374_v22 = vadd.f32 %v373_v17, %v372_v10  ;;  %v401_v23 = vrot.slane %v400_v18, 2  ;;  %v462_v10 = vsub.s32 3, %v1631_v24 }
 0x23d   :  { %1288 = vrsqrt.f32 %v436_v19  ;;  %v380_v25 = vadd.f32 %v379_v20, %v378_v14  ;;  %v407_v26 = vrot.slane %v406_v21, 2  ;;  %v459_v12 = vrot.slane %v356_v37, %v458_v9 }
 0x23e   :  { %v375_v27 = vrot.slane %v374_v22, 1  ;;  %v402_v28 = vadd.f32 %v401_v23, %v400_v18  ;;  %v463_v15 = vrot.slane %v356_v37, %v462_v10  ;;  %v484_v18 = vrot.slane %v358_v45, %v458_v9  ;;  %v904_v9 = vld [vmem:[%s1767_s4 + $0xd8] sm:$0xff] }
 0x23f   :  { %v381_v29 = vrot.slane %v380_v25, 1  ;;  %v408_v30 = vadd.f32 %v407_v26, %v406_v21  ;;  %v488_v20 = vrot.slane %v358_v45, %v462_v10  ;;  %v877_v45 = vld [vmem:[%s1767_s4] sm:$0xff] }
 0x240   :  { %v376_v1 = vadd.f32 %v375_v27, %v374_v22  ;;  %v403_v32 = vrot.slane %v402_v28, 1 }
 0x241   :  { %v382_v35 = vadd.f32 %v381_v29, %v380_v25  ;;  %v409_v36 = vrot.slane %v408_v30, 1 }
 0x242   :  { %v404_v38 = vadd.f32 %v403_v32, %v402_v28  ;;  %v413_v39 = vmul.f32 0.125, %v376_v1 }
 0x243   :  { %v410_v41 = vadd.f32 %v409_v36, %v408_v30  ;;  %v414_v42 = vmul.f32 0.125, %v382_v35 }
 0x244   :  { %v417_v43 = vmul.f32 0.125, %v404_v38  ;;  %v421_v44 = vmul.f32 %v413_v39, %v413_v39  ;;  %v433_v11 = vsub.f32 %v1619_v0, %v413_v39 }
 0x245   :  { %v418_v48 = vmul.f32 0.125, %v410_v41  ;;  %v422_v49 = vmul.f32 %v414_v42, %v414_v42  ;;  %v434_v14 = vsub.f32 %v1624_v5, %v414_v42  ;;  %v893_v42 = vld [vmem:[%s1767_s4 + $0x80] sm:$0xff] }
 0x246   :  { %v1287_v50 = vpop.eup %1286  ;;  %v425_v52 = vsub.f32 %v417_v43, %v421_v44  ;;  %v894_v43 = vld [vmem:[%s1767_s4 + $0x88] sm:$0xff] }
 0x247   :  { %v1289_v54 = vpop.eup %1288  ;;  %v443_v55 = vmul.f32 %v1287_v50, %v431_v46  ;;  %v426_v56 = vsub.f32 %v418_v48, %v422_v49  ;;  %v1236_v44 = vpack.c.bf16 %v894_v43, %v893_v42  ;;  %v878_v46 = vld [vmem:[%s1767_s4 + $0x8] sm:$0xff]  ;;  %v895_v48 = vld [vmem:[%s1767_s4 + $0x90] sm:$0xff]  ;;  %v896_v49 = vld [vmem:[%s1767_s4 + $0x98] sm:$0xff] }
 0x248   :  { %v444_v60 = vmul.f32 %v1289_v54, %v432_v51  ;;  %v429_v61 = vmax.f32 %v425_v52, 0.0  ;;  %v1240_v50 = vpack.c.bf16 %v896_v49, %v895_v48  ;;  %v879_v51 = vld [vmem:[%s1767_s4 + $0x10] sm:$0xff]  ;;  %v880_v52 = vld [vmem:[%s1767_s4 + $0x18] sm:$0xff]  ;;  %v897_v54 = vld [vmem:[%s1767_s4 + $0xa0] sm:$0xff] }
 0x249   :  { %v468_v57 = vmul.f32 %v451_v47, %v443_v55  ;;  %v430_v62 = vmax.f32 %v426_v56, 0.0  ;;  %v1238_v47 = vpack.c.bf16 %v878_v46, %v877_v45  ;;  %1237 = vmatprep.subr.bf16.mxu0 %v1236_v44  ;;  %v898_v55 = vld [vmem:[%s1767_s4 + $0xa8] sm:$0xff] }
 0x24a   :  { %v437_v63 = vadd.f32 1e-05, %v429_v61  ;;  %v469_v2 = vmul.f32 %v455_v53, %v444_v60  ;;  %v1242_v53 = vpack.c.bf16 %v880_v52, %v879_v51  ;;  %v1244_v56 = vpack.c.bf16 %v898_v55, %v897_v54  ;;  %v882_v60 = vld [vmem:[%s1767_s4 + $0x28] sm:$0xff]  ;;  %v899_v61 = vld [vmem:[%s1767_s4 + $0xb0] sm:$0xff] }
 0x24b   :  { %v438_v3 = vadd.f32 1e-05, %v430_v62  ;;  %v493_v4 = vadd.f32 %v476_v58, %v468_v57  ;;  %v881_v58 = vld [vmem:[%s1767_s4 + $0x20] sm:$0xff]  ;;  %v900_v57 = vld [vmem:[%s1767_s4 + $0xb8] sm:$0xff]  ;;  %v883_v62 = vld [vmem:[%s1767_s4 + $0x30] sm:$0xff] }
 0x24c   :  { %1290 = vrsqrt.f32 %v437_v63  ;;  %v494_v33 = vadd.f32 %v480_v31, %v469_v2  ;;  %v1246_v31 = vpack.c.bf16 %v882_v60, %v881_v58  ;;  %v884_v63 = vld [vmem:[%s1767_s4 + $0x38] sm:$0xff]  ;;  %v1248_v2 = vpack.c.bf16 %v900_v57, %v899_v61 }
 0x24d   :  { %1292 = vrsqrt.f32 %v438_v3  ;;  %v501_v59 = vmin.f32 %v493_v4, 0.0  ;;  %vm497_vm5 = vcmp.gt.f32.partialorder %v493_v4, 0.0  ;;  %v901_v3 = vld [vmem:[%s1767_s4 + $0xc0] sm:$0xff] }
 0x24e   :  { %v502_v6 = vmin.f32 %v494_v33, 0.0  ;;  %vm498_vm4 = vcmp.gt.f32.partialorder %v494_v33, 0.0 }
 0x24f   :  { %v505_v7 = vmul.f32 1.442695, %v501_v59 }
 0x250   :  { %v507_v8 = vmul.f32 1.442695, %v502_v6  ;;  %v885_v6 = vld [vmem:[%s1767_s4 + $0x40] sm:$0xff] }
 0x251   :  { %1294 = vpow2.f32 %v505_v7  ;;  %v886_v7 = vld [vmem:[%s1767_s4 + $0x48] sm:$0xff] }
 0x252   :  { %1296 = vpow2.f32 %v507_v8  ;;  %v903_v8 = vld [vmem:[%s1767_s4 + $0xd0] sm:$0xff]  ;;  %v1254_v10 = vpack.c.bf16 %v886_v7, %v885_v6 }
 0x256   :  { %v1291_v13 = vpop.eup %1290 }
 0x257   :  { %v1293_v16 = vpop.eup %1292  ;;  %v445_v17 = vmul.f32 %v1291_v13, %v433_v11  ;;  %v1256_v11 = vpack.c.bf16 %v904_v9, %v903_v8  ;;  %v888_v13 = vld [vmem:[%s1767_s4 + $0x58] sm:$0xff]  ;;  %v792_v9 = vld [vmem:[#allocation7 + $0x5] ss:$8 sm:$0x3] }
 0x258   :  { %v446_v19 = vmul.f32 %v1293_v16, %v434_v14  ;;  %v905_v14 = vld [vmem:[%s1767_s4 + $0xe0] sm:$0xff] }
 0x259   :  { %v470_v21 = vmul.f32 %v459_v12, %v445_v17  ;;  %v887_v12 = vld [vmem:[%s1767_s4 + $0x50] sm:$0xff] }
 0x25a   :  { %v471_v22 = vmul.f32 %v463_v15, %v446_v19  ;;  %v906_v15 = vld [vmem:[%s1767_s4 + $0xe8] sm:$0xff]  ;;  %v1258_v16 = vpack.c.bf16 %v888_v13, %v887_v12  ;;  %v843_v12 = vrot.slane %v792_v9, %v1634_v34 }
 0x25b   :  { %v1295_v23 = vpop.eup %1294  ;;  %v495_v25 = vadd.f32 %v484_v18, %v470_v21  ;;  %v1260_v17 = vpack.c.bf16 %v906_v15, %v905_v14  ;;  %v889_v18 = vld [vmem:[%s1767_s4 + $0x60] sm:$0xff]  ;;  %v890_v19 = vld [vmem:[%s1767_s4 + $0x68] sm:$0xff]  ;;  %v908_v21 = vld [vmem:[%s1767_s4 + $0xf8] sm:$0xff]  ;;  %v847_v15 = vrot.slane %v792_v9, %v1637_v40 }
 0x25c   :  { %v1297_v26 = vpop.eup %1296  ;;  %v1013_v27 = vadd.f32 -1.0, %v1295_v23  ;;  %v496_v28 = vadd.f32 %v488_v20, %v471_v22  ;;  %v907_v20 = vld [vmem:[%s1767_s4 + $0xf0] sm:$0xff]  ;;  %v1262_v22 = vpack.c.bf16 %v890_v19, %v889_v18 }
 0x25d   :  { %v1014_v24 = vadd.f32 -1.0, %v1297_v26  ;;  %v503_v29 = vmin.f32 %v495_v25, 0.0  ;;  %vm499_vm7 = vcmp.gt.f32.partialorder %v495_v25, 0.0  ;;  %v1264_v23 = vpack.c.bf16 %v908_v21, %v907_v20  ;;  %v892_v26 = vld [vmem:[%s1767_s4 + $0x78] sm:$0xff] }
 0x25e   :  { %v504_v0 = vmin.f32 %v496_v28, 0.0  ;;  %v517_v1 = vsel %vm497_vm5, %v493_v4, %v1013_v27  ;;  %vm500_vm6 = vcmp.gt.f32.partialorder %v496_v28, 0.0  ;;  %v902_v4 = vld [vmem:[%s1767_s4 + $0xc8] sm:$0xff] }
 0x25f   :  { %v518_v30 = vsel %vm498_vm4, %v494_v33, %v1014_v24  ;;  %v509_v5 = vmul.f32 1.442695, %v503_v29  ;;  %v1250_v33 = vpack.c.bf16 %v884_v63, %v883_v62  ;;  %v1252_v59 = vpack.c.bf16 %v902_v4, %v901_v3 }
 0x260   :  { %713 = vmatprep.mubr.f32.mxu0 %v518_v30  ;;  %v511_v32 = vmul.f32 1.442695, %v504_v0 }
 0x261   :  { %714 = vmatmul.mubr.f32.vlgmr.msra.gmra.mrb[2].mxu0 %v517_v1  ;;  %1298 = vpow2.f32 %v509_v5 }
 0x262   :  { %1300 = vpow2.f32 %v511_v32  ;;  %1239 = vmatpush3.bf16.msra.mxu0 %v1238_v47 }
 0x263   :  { %1241 = vmatprep.subr.bf16.mxu0 %v1240_v50 }
 0x266   :  { %1243 = vmatpush3.bf16.msra.mxu0 %v1242_v53 }
 0x267   :  { %1245 = vmatprep.subr.bf16.mxu0 %v1244_v56 }
 0x26a   :  { %1247 = vmatpush3.bf16.msra.mxu0 %v1246_v31 }
 0x26b   :  { %v1299_v35 = vpop.eup %1298  ;;  %1249 = vmatprep.subr.bf16.mxu0 %v1248_v2 }
 0x26c   :  { %v1301_v36 = vpop.eup %1300  ;;  %v1015_v37 = vadd.f32 -1.0, %v1299_v35 }
 0x26d   :  { %v1016_v38 = vadd.f32 -1.0, %v1301_v36 }
 0x26e   :  { %v519_v41 = vsel %vm499_vm7, %v495_v25, %v1015_v37  ;;  %1251 = vmatpush3.bf16.msra.mxu0 %v1250_v33  ;;  %v891_v25 = vld [vmem:[%s1767_s4 + $0x70] sm:$0xff]  ;;  %s1418_s4 = smov 64  }
 0x26f   :  { %v520_v39 = vsel %vm500_vm6, %v496_v28, %v1016_v38  ;;  %1253 = vmatprep.subr.bf16.mxu0 %v1252_v59  ;;  %v1266_v27 = vpack.c.bf16 %v892_v26, %v891_v25 }
 0x270   :  { %784 = vmatprep.mubr.f32.mxu1 %v520_v39 }
 0x271   :  { %785 = vmatmul.mubr.f32.vlgmr.msra.gmra.mrb[4].mxu1 %v519_v41 }
 0x272   :  { %1255 = vmatpush3.bf16.msra.mxu0 %v1254_v10  ;;  %v794_v10 = vld [vmem:[#allocation7 + $0x6] ss:$8 sm:$0x3] }
 0x273   :  { %1257 = vmatprep.subr.bf16.mxu0 %v1256_v11  ;;  %v856_v18 = vrot.slane %v794_v10, %v1634_v34  ;;  %v860_v20 = vrot.slane %v794_v10, %v1637_v40 }
 0x276   :  { %1259 = vmatpush3.bf16.msra.mxu0 %v1258_v16 }
 0x277   :  { %1261 = vmatprep.subr.bf16.mxu0 %v1260_v17 }
 0x27a   :  { %1263 = vmatpush3.bf16.msra.mxu0 %v1262_v22 }
 0x27b   :  { %1265 = vmatprep.subr.bf16.mxu0 %v1264_v23 }
 0x27e   :  { %1267 = vmatpush3.bf16.msra.mxu0 %v1266_v27 }
 0x334   :  { %v715_v28 = vpop.f32.mrb[2].mxu0 }
 0x335   :  { %v717_v24 = vpop.f32.mrb[3].mxu0 }
 0x344   :  { %v786_v29 = vpop.f32.mrb[4].mxu1 }
 0x345   :  { %v787_v0 = vadd.f32 %v786_v29, %v715_v28  ;;  %v788_v30 = vpop.f32.mrb[5].mxu1 }
 0x346   :  { %v789_v5 = vadd.f32 %v788_v30, %v717_v24 }
 0x347   :  { %v795_v1 = vrot.slane %v787_v0, 4  ;;  %v807_v32 = vmul.f32 %v787_v0, %v787_v0 }
 0x348   :  { %v801_v35 = vrot.slane %v789_v5, 4  ;;  %v808_v36 = vmul.f32 %v789_v5, %v789_v5 }
 0x349   :  { %v796_v37 = vadd.f32 %v795_v1, %v787_v0  ;;  %v809_v38 = vrot.slane %v807_v32, 4 }
 0x34a   :  { %v802_v39 = vadd.f32 %v801_v35, %v789_v5  ;;  %v815_v41 = vrot.slane %v808_v36, 4 }
 0x34b   :  { %v797_v42 = vrot.slane %v796_v37, 2  ;;  %v810_v43 = vadd.f32 %v809_v38, %v807_v32  ;;  %v909_v32 = vld [vmem:[#allocation7 + $0x7] ss:$0 sm:$0xff] }
 0x34c   :  { %v803_v44 = vrot.slane %v802_v39, 2  ;;  %v816_v45 = vadd.f32 %v815_v41, %v808_v36 }
 0x34d   :  { %v798_v46 = vadd.f32 %v797_v42, %v796_v37  ;;  %v811_v47 = vrot.slane %v810_v43, 2 }
 0x34e   :  { %v804_v48 = vadd.f32 %v803_v44, %v802_v39  ;;  %v817_v49 = vrot.slane %v816_v45, 2 }
 0x34f   :  { %v799_v50 = vrot.slane %v798_v46, 1  ;;  %v812_v51 = vadd.f32 %v811_v47, %v810_v43 }
 0x350   :  { %v805_v52 = vrot.slane %v804_v48, 1  ;;  %v818_v53 = vadd.f32 %v817_v49, %v816_v45 }
 0x351   :  { %v800_v54 = vadd.f32 %v799_v50, %v798_v46  ;;  %v813_v55 = vrot.slane %v812_v51, 1 }
 0x352   :  { %v806_v56 = vadd.f32 %v805_v52, %v804_v48  ;;  %v819_v58 = vrot.slane %v818_v53, 1 }
 0x353   :  { %v814_v60 = vadd.f32 %v813_v55, %v812_v51  ;;  %v821_v61 = vmul.f32 0.125, %v800_v54 }
 0x354   :  { %v820_v31 = vadd.f32 %v819_v58, %v818_v53  ;;  %v822_v57 = vmul.f32 0.125, %v806_v56 }
 0x355   :  { %v823_v62 = vmul.f32 0.125, %v814_v60  ;;  %v825_v63 = vmul.f32 %v821_v61, %v821_v61  ;;  %v831_v11 = vsub.f32 %v787_v0, %v821_v61 }
 0x356   :  { %v824_v2 = vmul.f32 0.125, %v820_v31  ;;  %v826_v3 = vmul.f32 %v822_v57, %v822_v57  ;;  %v832_v14 = vsub.f32 %v789_v5, %v822_v57 }
 0x357   :  { %v827_v4 = vsub.f32 %v823_v62, %v825_v63 }
 0x358   :  { %v828_v33 = vsub.f32 %v824_v2, %v826_v3 }
 0x359   :  { %v829_v59 = vmax.f32 %v827_v4, 0.0 }
 0x35a   :  { %v830_v6 = vmax.f32 %v828_v33, 0.0 }
 0x35b   :  { %v833_v7 = vadd.f32 1e-05, %v829_v59 }
 0x35c   :  { %v834_v8 = vadd.f32 1e-05, %v830_v6 }
 0x35d   :  { %1302 = vrsqrt.f32 %v833_v7 }
 0x35e   :  { %1304 = vrsqrt.f32 %v834_v8 }
 0x367   :  { %v1303_v13 = vpop.eup %1302 }
 0x368   :  { %v1305_v16 = vpop.eup %1304  ;;  %v837_v17 = vmul.f32 %v1303_v13, %v831_v11 }
 0x369   :  { %v838_v19 = vmul.f32 %v1305_v16, %v832_v14 }
 0x36a   :  { %v850_v21 = vmul.f32 %v843_v12, %v837_v17 }
 0x36b   :  { %v851_v22 = vmul.f32 %v847_v15, %v838_v19 }
 0x36c   :  { %v863_v23 = vadd.f32 %v856_v18, %v850_v21 }
 0x36d   :  { %v864_v25 = vadd.f32 %v860_v20, %v851_v22 }
 0x36e   :  { %v867_v26 = vmin.f32 %v863_v23, 0.0  ;;  %vm865_vm9 = vcmp.gt.f32.partialorder %v863_v23, 0.0 }
 0x36f   :  { %v868_v27 = vmin.f32 %v864_v25, 0.0  ;;  %vm866_vm8 = vcmp.gt.f32.partialorder %v864_v25, 0.0 }
 0x370   :  { %v869_v28 = vmul.f32 1.442695, %v867_v26 }
 0x371   :  { %v871_v24 = vmul.f32 1.442695, %v868_v27 }
 0x372   :  { %1306 = vpow2.f32 %v869_v28 }
 0x373   :  { %1308 = vpow2.f32 %v871_v24 }
 0x37c   :  { %v1307_v29 = vpop.eup %1306 }
 0x37d   :  { %v1309_v0 = vpop.eup %1308  ;;  %v1017_v30 = vadd.f32 -1.0, %v1307_v29 }
 0x37e   :  { %v1018_v5 = vadd.f32 -1.0, %v1309_v0 }
 0x37f   :  { %v875_v34 = vsel %vm865_vm9, %v863_v23, %v1017_v30 }
 0x380   :  { %v876_v1 = vsel %vm866_vm8, %v864_v25, %v1018_v5 }
 0x381   :  { %974 = vmatprep.mubr.f32.mxu0 %v876_v1 }
 0x382   :  { %975 = vmatmul.mubr.f32.vlgmr.msra.gmra.mrb[4].mxu0 %v875_v34 }
 0x455   :  { %v1056_v40 = vpop.f32.mrb[4].mxu0 }
 0x456   :  { %v1057_v35 = vpop.f32.mrb[5].mxu0 }
 0x457   :  { %v1058_v36 = vadd.f32 %v1057_v35, %v1056_v40 }
 0x459   :  { %v977_v37 = vadd.f32 %v1058_v36, %v909_v32 }
 0x45b   :  { %v980_v38 = vsub.f32 0.0, %v977_v37 }
 0x45d   :  { %v981_v39 = vmul.f32 1.442695, %v980_v38 }
 0x45f   :  { %1310 = vpow2.f32 %v981_v39 }
 0x469   :  { %v1311_v41 = vpop.eup %1310 }
 0x46a   :  { %v983_v42 = vadd.f32 1.0, %v1311_v41 }
 0x46c   :  { %1312 = vrcp.f32 %v983_v42 }
 0x476   :  { %v1313_v43 = vpop.eup %1312 }
 0x477   :  { %988 = vrot.lane.b32.xlu0 %v1313_v43, %s1418_s4 }
 0x4e9   :  { %v989_v44 = vpop.permute.xlu0 %988 }
 0x4ea   :  { %992 = vst.msk [vmem:[#allocation8] sm:$0xff] %vm991_vm10, %v989_v44 }
 0x4eb   :  { %1391 = shalt.err (!%p1388_p0)
}
 0x4ec   :  { %s1392_s28 = scalar_lea.hbm %s1769_s6, 128 }
 0x4ed   :  { %p1393_p1 = scmp.ne.s32.totalorder %s1769_s6, %s1392_s28  ;;  %p1396_p2 = scmp.lt.u32.totalorder %s1392_s28, %s1769_s6 }
 0x4ef   :  { %p1398_p3 = pnand %p1396_p2, %p1393_p1 }
 0x4f1   :  { %1401 = shalt.err (!%p1398_p3)
}
 0x4f2   :  { %1002 = dma.vmem_to_hbm [thread:$0]  %s1000_s24, 128, %s1769_s6, [#allocation4]  }
 0x4f3   :  { %1406 = dma.done.wait [#allocation4], 128  }
 0x4f4   :  { %1407 = vsyncadd [#allocation4], 4294967168 }
 0x4f5   :  { %1006 = vsyncpa [#allocation3], 1 }
 0x4f6   :  { %1007 = vsyncpa [#allocation6], 1 }
 0x4f7   :  { %1008 = vsyncpa [#allocation4], 1 }

</bundles_post_ra>
